<compile_context>
chip_gen: v7x
topology: tpu7x:2x2x1
jax: 0.10.0
libtpu: 0.0.40
codegen_flags: <defaults>
</compile_context>

<pallas_src>
import functools

import numpy as np
import jax
import jax.numpy as jnp
from jax.experimental import pallas as pl
from jax.experimental.pallas import tpu as pltpu


# ---------------- kernel ----------------

def _unified_head_kernel(x_ref, wcat_ref, bcat_ref, wcls_ref, bcls_ref, pool_ref, ut_ref,
                         slab_ref, cls_ref, segup_ref, *, num_seg):
    x = x_ref[0]                                                        # (C, H*W) channels-first

    # seg + det 1x1 convolutions fused into one matmul over the concatenated weight.
    slab = (jnp.dot(wcat_ref[...], x, preferred_element_type=jnp.float32)
            + bcat_ref[...])                                            # (num_seg+out_ch, H*W)
    slab_ref[0] = slab

    # cls head: AdaptiveAvgPool2d(1) as a matmul with a 1/(H*W) column (MXU), then Linear.
    pooled = jnp.dot(x, pool_ref[...], preferred_element_type=jnp.float32)          # (C, 1)
    cls_ref[0] = (jnp.dot(wcls_ref[...], pooled, preferred_element_type=jnp.float32)
                  + bcls_ref[...])                                      # (num_cls, 1)

    # seg head: bilinear x4 upsample (align_corners=False) == matmul with kron(Ah, Aw)^T.
    # Bias is already included in `slab`, matching Conv2d -> Upsample ordering exactly.
    seg_small = slab[:num_seg, :]                                       # (num_seg, H*W)
    segup_ref[0] = jnp.dot(seg_small, ut_ref[...],
                           preferred_element_type=jnp.float32)          # (num_seg, 16*H*W)


# ---------------- host-side helpers ----------------

def bilinear_matrix(out_size: int, in_size: int, scale: float) -> np.ndarray:
    """Interpolation matrix matching nn.Upsample(mode='bilinear', align_corners=False)."""
    A = np.zeros((out_size, in_size), np.float32)
    for i in range(out_size):
        src = (i + 0.5) / scale - 0.5
        src = max(src, 0.0)                       # PyTorch clamps negative source coords
        h0 = min(int(np.floor(src)), in_size - 1)
        h1 = min(h0 + 1, in_size - 1)
        frac = src - h0
        A[i, h0] += 1.0 - frac
        A[i, h1] += frac
    return A


def unified_head_forward(x_nchw, params, ut):
    """params use PyTorch orientation: w* are (out_features, in_ch), b* are (out_features,)."""
    N, C, H, W = x_nchw.shape
    num_seg = params["wseg"].shape[0]
    out_ch = params["wdet"].shape[0]
    num_cls = params["wcls"].shape[0]
    HW = H * W
    HW4 = 16 * HW
    n_rows = num_seg + out_ch

    x_cf = x_nchw.reshape(N, C, HW)                                     # free reshape (NCHW)

    # Concatenated 1x1-conv weights / biases: rows [0:num_seg) = seg, [num_seg:) = det.
    w_cat = jnp.concatenate([params["wseg"], params["wdet"]], axis=0)   # (n_rows, C)
    b_cat = jnp.concatenate([params["bseg"], params["bdet"]])[:, None]  # (n_rows, 1)
    wcls = params["wcls"]                                               # (num_cls, C)
    bcls_col = params["bcls"][:, None]                                  # (num_cls, 1)
    pool_col = jnp.full((HW, 1), 1.0 / HW, jnp.float32)                 # avg-pool as matmul

    kernel = functools.partial(_unified_head_kernel, num_seg=num_seg)

    slab, cls_col, segup = pl.pallas_call(
        kernel,
        out_shape=(jax.ShapeDtypeStruct((N, n_rows, HW), jnp.float32),
                   jax.ShapeDtypeStruct((N, num_cls, 1), jnp.float32),
                   jax.ShapeDtypeStruct((N, num_seg, HW4), jnp.float32)),
        grid=(N,),
        in_specs=[pl.BlockSpec((1, C, HW), lambda n: (n, 0, 0)),
                  pl.BlockSpec((n_rows, C), lambda n: (0, 0)),
                  pl.BlockSpec((n_rows, 1), lambda n: (0, 0)),
                  pl.BlockSpec((num_cls, C), lambda n: (0, 0)),
                  pl.BlockSpec((num_cls, 1), lambda n: (0, 0)),
                  pl.BlockSpec((HW, 1), lambda n: (0, 0)),
                  pl.BlockSpec((HW, HW4), lambda n: (0, 0))],
        out_specs=(pl.BlockSpec((1, n_rows, HW), lambda n: (n, 0, 0)),
                   pl.BlockSpec((1, num_cls, 1), lambda n: (n, 0, 0)),
                   pl.BlockSpec((1, num_seg, HW4), lambda n: (n, 0, 0))),
        compiler_params=pltpu.CompilerParams(dimension_semantics=("parallel",)),
    )(x_cf, w_cat, b_cat, wcls, bcls_col, pool_col, ut)

    cls_out = cls_col[:, :, 0]                                          # (N, num_cls)
    det_out = slab[:, num_seg:, :].reshape(N, out_ch, H, W)             # NCHW, free reshape
    seg_out = segup.reshape(N, num_seg, 4 * H, 4 * W)                   # NCHW, free reshape
    return cls_out, seg_out, det_out


# ---------------- main ----------------

if __name__ == "__main__":
    N, C, H, W = 2, 32, 8, 8
    num_cls, num_seg, num_det_cls, num_anchors = 5, 3, 4, 3
    out_ch = num_anchors * (4 + 1 + num_det_cls)            # 27

    key = jax.random.PRNGKey(0)
    k = jax.random.split(key, 7)
    x = jax.random.normal(k[0], (N, C, H, W), jnp.float32)
    params = {
        # PyTorch orientation: Linear weight (out, in), Conv2d 1x1 weight (out, in)
        "wcls": jax.random.normal(k[1], (num_cls, C), jnp.float32) * 0.1,
        "bcls": jax.random.normal(k[2], (num_cls,), jnp.float32) * 0.1,
        "wseg": jax.random.normal(k[3], (num_seg, C), jnp.float32) * 0.1,
        "bseg": jax.random.normal(k[4], (num_seg,), jnp.float32) * 0.1,
        "wdet": jax.random.normal(k[5], (out_ch, C), jnp.float32) * 0.1,
        "bdet": jax.random.normal(k[6], (out_ch,), jnp.float32) * 0.1,
    }
    ah = bilinear_matrix(4 * H, H, 4.0)                     # (4H, H)
    aw = bilinear_matrix(4 * W, W, 4.0)                     # (4W, W)
    # kron(Ah, Aw)[i*4W + j, h*W + w] = Ah[i,h] * Aw[j,w]; transposed for the in-kernel matmul.
    ut = jnp.asarray(np.kron(ah, aw).T)                     # (H*W, 16*H*W)

    cls_out, seg_out, det_out = unified_head_forward(x, params, ut)
    jax.block_until_ready((cls_out, seg_out, det_out))

    # pure-JAX reference (mirrors the PyTorch forward semantics)
    ah_j, aw_j = jnp.asarray(ah), jnp.asarray(aw)
    pooled = x.mean(axis=(2, 3))                                            # (N, C)
    cls_ref = pooled @ params["wcls"].T + params["bcls"]
    seg_small_ref = (jnp.einsum("nchw,sc->nshw", x, params["wseg"])
                     + params["bseg"][None, :, None, None])
    seg_ref = jnp.einsum("ih,jw,nshw->nsij", ah_j, aw_j, seg_small_ref)
    det_ref = (jnp.einsum("nchw,dc->ndhw", x, params["wdet"])
               + params["bdet"][None, :, None, None])

    assert cls_out.shape == (N, num_cls)
    assert seg_out.shape == (N, num_seg, 4 * H, 4 * W)
    assert det_out.shape == (N, out_ch, H, W)
    np.testing.assert_allclose(np.asarray(cls_out), np.asarray(cls_ref), rtol=1e-4, atol=1e-4)
    np.testing.assert_allclose(np.asarray(seg_out), np.asarray(seg_ref), rtol=1e-4, atol=1e-4)
    np.testing.assert_allclose(np.asarray(det_out), np.asarray(det_ref), rtol=1e-4, atol=1e-4)
    print("KERNEL_OK")
</pallas_src>

<mosaic_0001>
module attributes {stable_mosaic.version = 11 : i64} {
  func.func @_unified_head_kernel(%arg0: i32, %arg1: memref<1x32x64xf32, #tpu.memory_space<vmem>>, %arg2: memref<30x32xf32, #tpu.memory_space<vmem>>, %arg3: memref<30x1xf32, #tpu.memory_space<vmem>>, %arg4: memref<5x32xf32, #tpu.memory_space<vmem>>, %arg5: memref<5x1xf32, #tpu.memory_space<vmem>>, %arg6: memref<64x1xf32, #tpu.memory_space<vmem>>, %arg7: memref<64x1024xf32, #tpu.memory_space<vmem>>, %arg8: memref<1x30x64xf32, #tpu.memory_space<vmem>>, %arg9: memref<1x5x1xf32, #tpu.memory_space<vmem>>, %arg10: memref<1x3x1024xf32, #tpu.memory_space<vmem>>) attributes {dimension_semantics = [#tpu.dimension_semantics<parallel>], iteration_bounds = array<i64: 2>, scalar_prefetch = 0 : i64, scratch_operands = 0 : i64, tpu.core_type = #tpu.core_type<tc>, window_params = [{transform_indices = @transform_0, window_bounds = array<i64: 1, 32, 64>}, {pipeline_mode = #tpu.pipeline_mode<synchronous>, transform_indices = @transform_1, window_bounds = array<i64: 30, 32>}, {pipeline_mode = #tpu.pipeline_mode<synchronous>, transform_indices = @transform_2, window_bounds = array<i64: 30, 1>}, {pipeline_mode = #tpu.pipeline_mode<synchronous>, transform_indices = @transform_3, window_bounds = array<i64: 5, 32>}, {pipeline_mode = #tpu.pipeline_mode<synchronous>, transform_indices = @transform_4, window_bounds = array<i64: 5, 1>}, {pipeline_mode = #tpu.pipeline_mode<synchronous>, transform_indices = @transform_5, window_bounds = array<i64: 64, 1>}, {pipeline_mode = #tpu.pipeline_mode<synchronous>, transform_indices = @transform_6, window_bounds = array<i64: 64, 1024>}, {transform_indices = @transform_7, window_bounds = array<i64: 1, 30, 64>}, {transform_indices = @transform_8, window_bounds = array<i64: 1, 5, 1>}, {transform_indices = @transform_9, window_bounds = array<i64: 1, 3, 1024>}]} {
    %c0 = arith.constant 0 : index
    %c0_0 = arith.constant 0 : index
    %c0_1 = arith.constant 0 : index
    %0 = vector.load %arg1[%c0, %c0_0, %c0_1] : memref<1x32x64xf32, #tpu.memory_space<vmem>>, vector<1x32x64xf32>
    %1 = vector.shape_cast %0 : vector<1x32x64xf32> to vector<32x64xf32>
    %c0_2 = arith.constant 0 : index
    %c0_3 = arith.constant 0 : index
    %2 = vector.load %arg2[%c0_2, %c0_3] : memref<30x32xf32, #tpu.memory_space<vmem>>, vector<30x32xf32>
    %cst = arith.constant dense<0.000000e+00> : vector<30x64xf32>
    %3 = tpu.matmul %2, %1, %cst {dimension_numbers = #tpu.dot_dimension_numbers<[1], [0], [0], [1], [0, 0, 1, 1], [], []>} : vector<30x32xf32>, vector<32x64xf32>, vector<30x64xf32> -> vector<30x64xf32>
    %c0_4 = arith.constant 0 : index
    %c0_5 = arith.constant 0 : index
    %4 = vector.load %arg3[%c0_4, %c0_5] : memref<30x1xf32, #tpu.memory_space<vmem>>, vector<30x1xf32>
    %5 = vector.broadcast %4 : vector<30x1xf32> to vector<30x64xf32>
    %6 = arith.addf %3, %5 : vector<30x64xf32>
    %c0_6 = arith.constant 0 : index
    %c0_7 = arith.constant 0 : index
    %c0_8 = arith.constant 0 : index
    %7 = vector.load %arg8[%c0_6, %c0_7, %c0_8] : memref<1x30x64xf32, #tpu.memory_space<vmem>>, vector<1x30x64xf32>
    %8 = vector.shape_cast %7 : vector<1x30x64xf32> to vector<30x64xf32>
    %9 = vector.shape_cast %6 : vector<30x64xf32> to vector<1x30x64xf32>
    tpu.vector_store %arg8[%c0_6, %c0_7, %c0_8], %9 {strides = array<i32>} : memref<1x30x64xf32, #tpu.memory_space<vmem>>, vector<1x30x64xf32>,
    %c0_9 = arith.constant 0 : index
    %c0_10 = arith.constant 0 : index
    %10 = vector.load %arg6[%c0_9, %c0_10] : memref<64x1xf32, #tpu.memory_space<vmem>>, vector<64x1xf32>
    %cst_11 = arith.constant dense<0.000000e+00> : vector<32x1xf32>
    %11 = tpu.matmul %1, %10, %cst_11 {dimension_numbers = #tpu.dot_dimension_numbers<[1], [0], [0], [1], [0, 0, 1, 1], [], []>} : vector<32x64xf32>, vector<64x1xf32>, vector<32x1xf32> -> vector<32x1xf32>
    %c0_12 = arith.constant 0 : index
    %c0_13 = arith.constant 0 : index
    %12 = vector.load %arg4[%c0_12, %c0_13] : memref<5x32xf32, #tpu.memory_space<vmem>>, vector<5x32xf32>
    %cst_14 = arith.constant dense<0.000000e+00> : vector<5x1xf32>
    %13 = tpu.matmul %12, %11, %cst_14 {dimension_numbers = #tpu.dot_dimension_numbers<[1], [0], [0], [1], [0, 0, 1, 1], [], []>} : vector<5x32xf32>, vector<32x1xf32>, vector<5x1xf32> -> vector<5x1xf32>
    %c0_15 = arith.constant 0 : index
    %c0_16 = arith.constant 0 : index
    %14 = vector.load %arg5[%c0_15, %c0_16] : memref<5x1xf32, #tpu.memory_space<vmem>>, vector<5x1xf32>
    %15 = arith.addf %13, %14 : vector<5x1xf32>
    %c0_17 = arith.constant 0 : index
    %c0_18 = arith.constant 0 : index
    %c0_19 = arith.constant 0 : index
    %16 = vector.load %arg9[%c0_17, %c0_18, %c0_19] : memref<1x5x1xf32, #tpu.memory_space<vmem>>, vector<1x5x1xf32>
    %17 = vector.shape_cast %16 : vector<1x5x1xf32> to vector<5x1xf32>
    %18 = vector.shape_cast %15 : vector<5x1xf32> to vector<1x5x1xf32>
    tpu.vector_store %arg9[%c0_17, %c0_18, %c0_19], %18 {strides = array<i32>} : memref<1x5x1xf32, #tpu.memory_space<vmem>>, vector<1x5x1xf32>,
    %19 = vector.extract_strided_slice %6 {offsets = [0, 0], sizes = [3, 64], strides = [1, 1]} : vector<30x64xf32> to vector<3x64xf32>
    %c0_20 = arith.constant 0 : index
    %c0_21 = arith.constant 0 : index
    %20 = vector.load %arg7[%c0_20, %c0_21] : memref<64x1024xf32, #tpu.memory_space<vmem>>, vector<64x1024xf32>
    %cst_22 = arith.constant dense<0.000000e+00> : vector<3x1024xf32>
    %21 = tpu.matmul %19, %20, %cst_22 {dimension_numbers = #tpu.dot_dimension_numbers<[1], [0], [0], [1], [0, 0, 1, 1], [], []>} : vector<3x64xf32>, vector<64x1024xf32>, vector<3x1024xf32> -> vector<3x1024xf32>
    %c0_23 = arith.constant 0 : index
    %c0_24 = arith.constant 0 : index
    %c0_25 = arith.constant 0 : index
    %22 = vector.load %arg10[%c0_23, %c0_24, %c0_25] : memref<1x3x1024xf32, #tpu.memory_space<vmem>>, vector<1x3x1024xf32>
    %23 = vector.shape_cast %22 : vector<1x3x1024xf32> to vector<3x1024xf32>
    %24 = vector.shape_cast %21 : vector<3x1024xf32> to vector<1x3x1024xf32>
    tpu.vector_store %arg10[%c0_23, %c0_24, %c0_25], %24 {strides = array<i32>} : memref<1x3x1024xf32, #tpu.memory_space<vmem>>, vector<1x3x1024xf32>,
    return
  }
  func.func @transform_0(%arg0: i32) -> (i32, i32, i32) {
    %c0_i32 = arith.constant 0 : i32
    %c0_i32_0 = arith.constant 0 : i32
    %c0_i32_1 = arith.constant 0 : i32
    return %arg0, %c0_i32, %c0_i32_0 : i32, i32, i32
  }
  func.func @transform_1(%arg0: i32) -> (i32, i32) {
    %c0_i32 = arith.constant 0 : i32
    %c0_i32_0 = arith.constant 0 : i32
    %c0_i32_1 = arith.constant 0 : i32
    return %c0_i32, %c0_i32_0 : i32, i32
  }
  func.func @transform_2(%arg0: i32) -> (i32, i32) {
    %c0_i32 = arith.constant 0 : i32
    %c0_i32_0 = arith.constant 0 : i32
    %c0_i32_1 = arith.constant 0 : i32
    return %c0_i32, %c0_i32_0 : i32, i32
  }
  func.func @transform_3(%arg0: i32) -> (i32, i32) {
    %c0_i32 = arith.constant 0 : i32
    %c0_i32_0 = arith.constant 0 : i32
    %c0_i32_1 = arith.constant 0 : i32
    return %c0_i32, %c0_i32_0 : i32, i32
  }
  func.func @transform_4(%arg0: i32) -> (i32, i32) {
    %c0_i32 = arith.constant 0 : i32
    %c0_i32_0 = arith.constant 0 : i32
    %c0_i32_1 = arith.constant 0 : i32
    return %c0_i32, %c0_i32_0 : i32, i32
  }
  func.func @transform_5(%arg0: i32) -> (i32, i32) {
    %c0_i32 = arith.constant 0 : i32
    %c0_i32_0 = arith.constant 0 : i32
    %c0_i32_1 = arith.constant 0 : i32
    return %c0_i32, %c0_i32_0 : i32, i32
  }
  func.func @transform_6(%arg0: i32) -> (i32, i32) {
    %c0_i32 = arith.constant 0 : i32
    %c0_i32_0 = arith.constant 0 : i32
    %c0_i32_1 = arith.constant 0 : i32
    return %c0_i32, %c0_i32_0 : i32, i32
  }
  func.func @transform_7(%arg0: i32) -> (i32, i32, i32) {
    %c0_i32 = arith.constant 0 : i32
    %c0_i32_0 = arith.constant 0 : i32
    %c0_i32_1 = arith.constant 0 : i32
    return %arg0, %c0_i32, %c0_i32_0 : i32, i32, i32
  }
  func.func @transform_8(%arg0: i32) -> (i32, i32, i32) {
    %c0_i32 = arith.constant 0 : i32
    %c0_i32_0 = arith.constant 0 : i32
    %c0_i32_1 = arith.constant 0 : i32
    return %arg0, %c0_i32, %c0_i32_0 : i32, i32, i32
  }
  func.func @transform_9(%arg0: i32) -> (i32, i32, i32) {
    %c0_i32 = arith.constant 0 : i32
    %c0_i32_0 = arith.constant 0 : i32
    %c0_i32_1 = arith.constant 0 : i32
    return %arg0, %c0_i32, %c0_i32_0 : i32, i32, i32
  }
}

</mosaic_0001>

<bundles_post_ra>
// kernel: tpu_custom_call.1
= control target key start
LH: loop header
LB: loop body
LE: loop exit
PB: predicated region body
PF: predicated region fallthrough
CT: control target
= control target key end

     0   :  { %15 = vsyncpa [#allocation3], 0  ;;  %s1513_s30 = smov 0   ;;  %s1674_s0 = inlined_call_operand.vmem [shape: f32[2,32,64], index: 0, kind: input, shape index: {}]   ;;  %s1675_s1 = inlined_call_operand.vmem [shape: f32[30,32], index: 1, kind: input, shape index: {}]   ;;  %s1676_s2 = inlined_call_operand.vmem [shape: f32[30,1], index: 2, kind: input, shape index: {}]   ;;  %s1677_s3 = inlined_call_operand.vmem [shape: f32[5,32], index: 3, kind: input, shape index: {}]   ;;  %s1678_s4 = inlined_call_operand.vmem [shape: f32[5,1], index: 4, kind: input, shape index: {}]   ;;  %s1679_s5 = inlined_call_operand.vmem [shape: f32[64,1], index: 5, kind: input, shape index: {}]   ;;  %s1680_s6 = inlined_call_operand.hbm [shape: f32[64,1024], index: 6, kind: input, shape index: {}]   ;;  %s1681_s7 = inlined_call_operand.vmem [shape: f32[2,30,64], index: 7, kind: output, shape index: {0}]   ;;  %s1682_s8 = inlined_call_operand.vmem [shape: f32[2,5,1], index: 8, kind: output, shape index: {1}]   ;;  %s1683_s9 = inlined_call_operand.vmem [shape: f32[2,3,1024], index: 9, kind: output, shape index: {2}]  }
   0x1 LB: > { %s1519_s10 = sadd.s32 4294967295, %s1454_s30   ;;  %p1193_p0 = scmp.ge.s32.totalorder %s1454_s30, 1  ;;  %s1454_s30 = sphi %s1513_s30, %s21_s30  }
   0x2   : > { %p256_p1 = scmp.lt.s32.totalorder %s1454_s30, 3  ;;  %s1456_s11 = smov [#allocation2]  }
   0x3   : > { %s283_s12 = sshll.u32 %s1456_s11, 4  ;;  %p1684_p3 = scmp.eq.s32.totalorder %s1519_s10, 0  ;;  %s284_s12 = int_to_ptr.vmem [resolvable:$true] %s283_s12 }
   0x4   : > { %p1523_p2 = pnand %p1193_p0, %p256_p1  ;;  %s1416_s17 = scalar_lea.hbm %s1680_s6, 8192 }
   0x5   : > { %p1417_p6 = scmp.ne.s32.totalorder %s1680_s6, %s1416_s17  ;;  %p1423_p10 = scmp.lt.u32.totalorder %s1416_s17, %s1680_s6 }
   0x6   : > { %s1686_s13 = scalar_select %p1523_p2, 1, 0 }
   0x7   : > { %p1393_p4 = pneg %p1523_p2 }
   0x9   : > { %p1532_p5 = pnand %p1684_p3, %p1393_p4 }
   0xb   : > { %p1418_p7 = pneg %p1532_p5 }
   0xd   : > { %p1419_p8 = pnand %p1418_p7, %p1417_p6 }
   0xf   : > { %p1420_p9 = pneg %p1419_p8 }
  0x11   : > { %p1425_p11 = pnand %p1423_p10, %p1420_p9 }
  0x13   : > { %1428 = shalt.err (!%p1425_p11)
}
  0x14   : > { %s1429_s22 = scalar_lea.vmem %s284_s12, 8192  ;;  %p1437_p1 = scmp.lt.s32.totalorder %s284_s12, %s284_s12 }
  0x15   : > { %p1430_p12 = scmp.ne.s32.totalorder %s284_s12, %s1429_s22  ;;  %p1438_p4 = scmp.lt.s32.totalorder %s1429_s22, %s1429_s22 }
  0x17   : > { %p1432_p13 = pnand %p1430_p12, %p1418_p7  ;;  %p1439_p3 = por %p1438_p4, %p1437_p1 }
  0x19   : > { %p1433_p0 = pneg %p1432_p13 }
  0x1b   : > { %p1440_p2 = pnand %p1439_p3, %p1433_p0 }
  0x1d   : > { %1443 = shalt.err (!%p1440_p2)
}
  0x1e   : > { %s1457_s23 = smov 1024   ;;  %s1458_s24 = smov 64  }
  0x1f   : > { %1396 = dma.hbm_to_vmem [thread:$0]  (!%p1532_p5), %s1680_s6, 8192, %s284_s12, [#allocation3], %s1457_s23, %s1457_s23, %s1458_s24  }
  0x20   : > { %p1688_p6 = scmp.ne.s32.totalorder %s1686_s13, 0 }
  0x21   : > { %p1689_p8 = scmp.eq.s32.totalorder (!%p1688_p6), %s1519_s10, 0 }
  0x22   : > { %307 = sbr.rel (%p1688_p6) target bundleno = 531 (0x213), region = 48 }
  0x29   : > { %1449 = dma.done.wait (%p1689_p8), [#allocation3], 8192   ;;  %p1690_p7 = pmov %p1689_p8 }
  0x2a   : > { %p352_p2 = scmp.lt.s32.totalorder %s1519_s10, 1  ;;  %v1459_v0 = vmov 0   ;;  %v507_v1 = vld [vmem:[%s1679_s5] sm:$0xff]  ;;  %v508_v2 = vld [vmem:[%s1679_s5 + $0x8] sm:$0xff]  ;;  %v509_v3 = vld [vmem:[%s1679_s5 + $0x10] sm:$0xff]  ;;  %vm501_vm0 = vcmask 523264  }
  0x2b   : > { %1451 = vsyncadd (%p1690_p7), [#allocation3], 4294959104  ;;  %1414 = vset.pattern.permute.xlu0 %v1459_v0  ;;  %1415 = vset.pattern.permute.xlu1 %v1459_v0  ;;  %v1303_v4 = vpack.c.bf16 %v508_v2, %v507_v1  ;;  %v510_v5 = vld [vmem:[%s1679_s5 + $0x18] sm:$0xff]  ;;  %v511_v7 = vld [vmem:[%s1679_s5 + $0x20] sm:$0xff]  ;;  %vm403_vm1 = vcmask 261120   ;;  %v1460_v41 = vmov 0.0|0.0  }
  0x2c   : > { %s1692_s10 = smov (!%p352_p2, %s1519_s10), 1  ;;  %v1307_v6 = vpack.c.bf16 %v510_v5, %v509_v3  ;;  %v512_v8 = vld [vmem:[%s1679_s5 + $0x28] sm:$0xff]  ;;  %v375_v15 = vld [vmem:[%s1675_s1] sm:$0xff]  ;;  %v513_v18 = vld [vmem:[%s1679_s5 + $0x30] sm:$0xff]  ;;  %vm1461_vm2 = vmmov 0   ;;  %v1462_v53 = vmov 0.0  }
  0x2d   : > { %s1563_s27 = sshll.u32 %s1692_s10, 5  ;;  %1304 = vmatprep.subr.bf16.mxu1 %v1303_v4  ;;  %v379_v16 = vld [vmem:[%s1676_s2] sm:$0xff]  ;;  %v1311_v17 = vpack.c.bf16 %v512_v8, %v511_v7  ;;  %1256 = vmatprep.mubr.msk.f32.mxu0 %vm403_vm1, %v375_v15  ;;  %v514_v19 = vld [vmem:[%s1679_s5 + $0x38] sm:$0xff]  ;;  %v380_v20 = vld [vmem:[%s1676_s2 + $0x8] sm:$0xff]  ;;  %vm505_vm3 = vcmask 521216   ;;  %s1202_s16 = sshll.u32 %s1692_s10, 3 }
  0x2e   : > { %s356_s11 = scalar_lea.vmem %s1674_s0, %s1563_s27  ;;  %1306 = vmatpush3.bf16.msra.mxu1 %v1303_v4  ;;  %385 = vperm.xlu0 %1414, %v379_v16   ;;  %v1315_v21 = vpack.c.bf16 %v514_v19, %v513_v18  ;;  %v692_v22 = vld [vmem:[#allocation2 + $0x18] sm:$0xff]  ;;  %v376_v24 = vld [vmem:[%s1675_s1 + $0x8] sm:$0xff]  ;;  %v691_v26 = vld [vmem:[#allocation2 + $0x10] sm:$0xff]  ;;  %s1632_s29 = scalar_lea.vmem %s1681_s7, %s1563_s27  ;;  %vm687_vm4 = vcmask 4096  }
  0x2f   : > { %v371_v9 = vld [vmem:[%s356_s11] sm:$0xff]  ;;  %v372_v10 = vld [vmem:[%s356_s11 + $0x8] sm:$0xff]  ;;  %v373_v11 = vld [vmem:[%s356_s11 + $0x10] sm:$0xff]  ;;  %1308 = vmatprep.subr.bf16.mxu1 %v1307_v6  ;;  %s370_s15 = scalar_lea.vmem %s1683_s9, %s1563_s27  ;;  %s365_s21 = scalar_lea.vmem %s1682_s8, %s1202_s16 }
  0x30   : > { %1278 = vmatprep.mubr.msk.f32.mxu1 %vm501_vm0, %v371_v9  ;;  %v374_v12 = vld [vmem:[%s356_s11 + $0x18] sm:$0xff]  ;;  %v1295_v13 = vpack.c.bf16 %v372_v10, %v371_v9  ;;  %v699_v27 = vld [vmem:[#allocation2 + $0x50] sm:$0xff]  ;;  %v698_v16 = vld [vmem:[#allocation2 + $0x48] sm:$0xff] }
  0x31   : > { %v1299_v14 = vpack.c.bf16 %v374_v12, %v373_v11  ;;  %v700_v23 = vld [vmem:[#allocation2 + $0x58] sm:$0xff]  ;;  %v1343_v30 = vpack.c.bf16 %v699_v27, %v691_v26  ;;  %v707_v32 = vld [vmem:[#allocation2 + $0x90] sm:$0xff] }
  0x32   : > { %1296 = vmatprep.subr.bf16.mxu0 %v1295_v13  ;;  %1310 = vmatpush3.bf16.msra.mxu1 %v1307_v6  ;;  %v1341_v25 = vpack.c.bf16 %v700_v23, %v692_v22  ;;  %v708_v28 = vld [vmem:[#allocation2 + $0x98] sm:$0xff]  ;;  %v715_v33 = vld [vmem:[#allocation2 + $0xd0] sm:$0xff] }
  0x33   : > { %1298 = vmatpush3.bf16.msra.mxu0 %v1295_v13  ;;  %1312 = vmatprep.subr.bf16.mxu1 %v1311_v17  ;;  %v716_v29 = vld [vmem:[#allocation2 + $0xd8] sm:$0xff]  ;;  %v1347_v34 = vpack.c.bf16 %v715_v33, %v707_v32  ;;  %v723_v38 = vld [vmem:[#allocation2 + $0x110] sm:$0xff] }
  0x34   : > { %1300 = vmatprep.subr.bf16.mxu0 %v1299_v14  ;;  %390 = vperm.xlu0 %1414, %v380_v20   ;;  %v1345_v31 = vpack.c.bf16 %v716_v29, %v708_v28  ;;  %v724_v35 = vld [vmem:[#allocation2 + $0x118] sm:$0xff]  ;;  %v731_v39 = vld [vmem:[#allocation2 + $0x150] sm:$0xff]  ;;  %v689_v20 = vld [vmem:[#allocation2] sm:$0xff] }
  0x35   : > { %v732_v36 = vld [vmem:[#allocation2 + $0x158] sm:$0xff]  ;;  %v1351_v40 = vpack.c.bf16 %v731_v39, %v723_v38  ;;  %v739_v45 = vld [vmem:[#allocation2 + $0x190] sm:$0xff]  ;;  %v706_v29 = vld [vmem:[#allocation2 + $0x88] sm:$0xff] }
  0x36   : > { %1314 = vmatpush3.bf16.msra.mxu1 %v1311_v17  ;;  %v1349_v37 = vpack.c.bf16 %v732_v36, %v724_v35  ;;  %v740_v42 = vld [vmem:[#allocation2 + $0x198] sm:$0xff]  ;;  %v747_v46 = vld [vmem:[#allocation2 + $0x1d0] sm:$0xff]  ;;  %v705_v35 = vld [vmem:[#allocation2 + $0x80] sm:$0xff] }
  0x37   : > { %1302 = vmatpush3.bf16.msra.mxu0 %v1299_v14  ;;  %1316 = vmatprep.subr.bf16.mxu1 %v1315_v21  ;;  %v748_v43 = vld [vmem:[#allocation2 + $0x1d8] sm:$0xff]  ;;  %v377_v47 = vld [vmem:[%s1675_s1 + $0x10] sm:$0xff]  ;;  %v1355_v48 = vpack.c.bf16 %v747_v46, %v739_v45  ;;  %v713_v36 = vld [vmem:[#allocation2 + $0xc0] sm:$0xff] }
  0x38   : > { %1319 = vmatprep.subr.bf16.mxu0 %v1460_v41  ;;  %v1353_v44 = vpack.c.bf16 %v748_v43, %v740_v42  ;;  %v378_v49 = vld [vmem:[%s1675_s1 + $0x18] sm:$0x3f]  ;;  %v381_v54 = vld [vmem:[%s1676_s2 + $0x10] sm:$0xff]  ;;  %v730_v38 = vld [vmem:[#allocation2 + $0x148] sm:$0xff]  ;;  %v1331_v39 = vpack.c.bf16 %v713_v36, %v705_v35 }
  0x39   : > { %v696_v50 = vld [vmem:[#allocation2 + $0x38] sm:$0xff]  ;;  %395 = vperm.xlu1 %1415, %v381_v54   ;;  %v695_v57 = vld [vmem:[#allocation2 + $0x30] sm:$0xff]  ;;  %v729_v42 = vld [vmem:[#allocation2 + $0x140] sm:$0xff] }
  0x3a   : > { %1257 = vmatmul.mubr.msk.f32.vlgmr.msra.gmra.mrb[0].mxu0 %vm403_vm1, %v376_v24  ;;  %1318 = vmatpush3.bf16.msra.mxu1 %v1315_v21  ;;  %v704_v51 = vld [vmem:[#allocation2 + $0x78] sm:$0xff]  ;;  %v703_v58 = vld [vmem:[#allocation2 + $0x70] sm:$0xff]  ;;  %v697_v24 = vld [vmem:[#allocation2 + $0x40] sm:$0xff] }
  0x3b   : > { %1342 = vmatprep.subr.bf16.mxu1 %v1341_v25  ;;  %1259 = vmatprep.mubr.msk.f32.mxu0 %vm403_vm1, %v377_v47  ;;  %v1373_v52 = vpack.c.bf16 %v704_v51, %v696_v50  ;;  %v382_v55 = vld [vmem:[%s1676_s2 + $0x18] sm:$0x3f]  ;;  %v1375_v0 = vpack.c.bf16 %v703_v58, %v695_v57  ;;  %v711_v4 = vld [vmem:[#allocation2 + $0xb0] sm:$0xff]  ;;  %v1327_v32 = vpack.c.bf16 %v697_v24, %v689_v20  ;;  %v738_v43 = vld [vmem:[#allocation2 + $0x188] sm:$0xff] }
  0x3c   : > { %v712_v60 = vld [vmem:[#allocation2 + $0xb8] sm:$0xff]  ;;  %v719_v5 = vld [vmem:[#allocation2 + $0xf0] sm:$0xff]  ;;  %v737_v47 = vld [vmem:[#allocation2 + $0x180] sm:$0xff] }
  0x3d   : > { %1279 = vmatmul.mubr.msk.f32.vlgmr.msra.gmra.mrb[0].mxu1 %vm501_vm0, %v372_v10  ;;  %400 = vperm.xlu1 %1415, %v382_v55   ;;  %v720_v61 = vld [vmem:[#allocation2 + $0xf8] sm:$0xff]  ;;  %v1379_v9 = vpack.c.bf16 %v719_v5, %v711_v4  ;;  %v727_v13 = vld [vmem:[#allocation2 + $0x130] sm:$0xff]  ;;  %v702_v50 = vld [vmem:[#allocation2 + $0x68] sm:$0xff] }
  0x3e   : > { %1281 = vmatprep.mubr.msk.f32.mxu1 %vm501_vm0, %v373_v11  ;;  %1344 = vmatpush1.bf16.msra.mxu1 %v1343_v30  ;;  %v1377_v3 = vpack.c.bf16 %v720_v61, %v712_v60  ;;  %v728_v6 = vld [vmem:[#allocation2 + $0x138] sm:$0xff]  ;;  %v690_v11 = vld [vmem:[#allocation2 + $0x8] sm:$0xff]  ;;  %v735_v14 = vld [vmem:[#allocation2 + $0x170] sm:$0xff] }
  0x3f   : > { %1346 = vmatprep.subr.bf16.mxu1 %v1345_v31  ;;  %1260 = vmatmul.mubr.msk.f32.gmra.mrb[2].mxu0 %vm403_vm1, %v378_v49  ;;  %v736_v7 = vld [vmem:[#allocation2 + $0x178] sm:$0xff]  ;;  %v1383_v21 = vpack.c.bf16 %v735_v14, %v727_v13  ;;  %v1325_v23 = vpack.c.bf16 %v698_v16, %v690_v11  ;;  %v743_v26 = vld [vmem:[#allocation2 + $0x1b0] sm:$0xff]  ;;  %v714_v30 = vld [vmem:[#allocation2 + $0xc8] sm:$0xff] }
  0x40   : > { %1292 = vmatprep.mubr.msk.f32.mxu0 %vm1461_vm2, %v1462_v53  ;;  %v744_v17 = vld [vmem:[#allocation2 + $0x1b8] sm:$0xff]  ;;  %v751_v27 = vld [vmem:[#allocation2 + $0x1f0] sm:$0xff]  ;;  %v612_v31 = vld [vmem:[%s1677_s3] sm:$0x1f] }
  0x41   : > { %1282 = vmatmul.mubr.msk.f32.gmra.mrb[2].mxu1 %vm501_vm0, %v374_v12  ;;  %v1381_v12 = vpack.c.bf16 %v736_v7, %v728_v6  ;;  %v752_v18 = vld [vmem:[#allocation2 + $0x1f8] sm:$0xff]  ;;  %v1387_v33 = vpack.c.bf16 %v751_v27, %v743_v26  ;;  %v694_v49 = vld [vmem:[#allocation2 + $0x28] sm:$0xff]  ;;  %v693_v54 = vld [vmem:[#allocation2 + $0x20] sm:$0xff] }
  0x42   : > { %1348 = vmatpush1.bf16.msra.mxu1 %v1347_v34  ;;  %891 = vmatprep.mubr.f32.mxu1 %v1462_v53  ;;  %v1385_v25 = vpack.c.bf16 %v752_v18, %v744_v17  ;;  %v1329_v34 = vpack.c.bf16 %v714_v30, %v706_v29  ;;  %v701_v55 = vld [vmem:[#allocation2 + $0x60] sm:$0xff]  ;;  %v718_v57 = vld [vmem:[#allocation2 + $0xe8] sm:$0xff] }
  0x43   : > { %1350 = vmatprep.subr.bf16.mxu1 %v1349_v37  ;;  %v722_v37 = vld [vmem:[#allocation2 + $0x108] sm:$0xff]  ;;  %v1359_v58 = vpack.c.bf16 %v701_v55, %v693_v54  ;;  %v709_v60 = vld [vmem:[#allocation2 + $0xa0] sm:$0xff] }
  0x44   : > { %v717_v61 = vld [vmem:[#allocation2 + $0xe0] sm:$0xff]  ;;  %v742_v5 = vld [vmem:[#allocation2 + $0x1a8] sm:$0xff] }
  0x45   : > { %v733_v4 = vld [vmem:[#allocation2 + $0x160] sm:$0xff]  ;;  %v750_v6 = vld [vmem:[#allocation2 + $0x1e8] sm:$0xff] }
  0x46   : > { %1352 = vmatpush1.bf16.msra.mxu1 %v1351_v40  ;;  %v1333_v40 = vpack.c.bf16 %v730_v38, %v722_v37 }
  0x47   : > { %1354 = vmatprep.subr.bf16.mxu1 %v1353_v44  ;;  %v746_v44 = vld [vmem:[#allocation2 + $0x1c8] sm:$0xff] }
  0x48   : > { %v1337_v46 = vpack.c.bf16 %v746_v44, %v738_v43 }
  0x4a   : > { %1356 = vmatpush1.bf16.msra.mxu1 %v1355_v48  ;;  %v745_v48 = vld [vmem:[#allocation2 + $0x1c0] sm:$0xff] }
  0x4b   : > { %1374 = vmatprep.subr.bf16.mxu1 %v1373_v52  ;;  %v1339_v51 = vpack.c.bf16 %v745_v48, %v737_v47  ;;  %v1357_v52 = vpack.c.bf16 %v702_v50, %v694_v49 }
  0xad   : > { %v386_v56 = vpop.permute.xlu0 %385 }
  0xb3   : > { %v391_v59 = vpop.permute.xlu0 %390 }
 0x10d   : > { %v1258_v62 = vpop.f32.mrb[0].mxu0 }
 0x10e   : > { %v482_v63 = vpop.f32.mrb[1].mxu0  ;;  %v488_v1 = vadd.f32 %v1258_v62, %v391_v59  ;;  %v726_v62 = vld [vmem:[#allocation2 + $0x128] sm:$0xff] }
 0x10f   : > { %v1634_v2 = vadd.f32 %v482_v63, %v386_v56  ;;  %v710_v56 = vld [vmem:[#allocation2 + $0xa8] sm:$0xff] }
 0x110   : > { %503 = vst.msk [vmem:[%s1632_s29 + $0x8] sm:$0xff] %vm501_vm0, %v488_v1  ;;  %v1280_v8 = vpop.f32.mrb[0].mxu1  ;;  %v1361_v59 = vpack.c.bf16 %v718_v57, %v710_v56  ;;  %v734_v63 = vld [vmem:[#allocation2 + $0x168] sm:$0xff] }
 0x111   : > { %502 = vst.msk [vmem:[%s1632_s29] sm:$0xff] %vm501_vm0, %v1634_v2  ;;  %1215 = vmatmul.mubr.msk.f32.vlgmr.msra.gmra.mrb[4].mxu1 %vm501_vm0, %v1634_v2  ;;  %v593_v10 = vpop.f32.mrb[1].mxu1  ;;  %v1365_v1 = vpack.c.bf16 %v734_v63, %v726_v62 }
 0x112   : > { %1376 = vmatpush1.bf16.msra.mxu1 %v1375_v0  ;;  %1033 = vmatprep.mubr.f32.mxu1 %v1462_v53  ;;  %v1320_v15 = vpack.c.bf16 %v1280_v8, %v593_v10  ;;  %v1363_v0 = vpack.c.bf16 %v717_v61, %v709_v60  ;;  %v1369_v8 = vpack.c.bf16 %v750_v6, %v742_v5  ;;  %v749_v10 = vld [vmem:[#allocation2 + $0x1e0] sm:$0xff]  ;;  %v1261_v13 = vpop.f32.mrb[2].mxu0 }
 0x113   : > { %1378 = vmatprep.subr.bf16.mxu1 %v1377_v3  ;;  %v725_v3 = vld [vmem:[#allocation2 + $0x120] sm:$0xff] }
 0x114   : > { %v1283_v19 = vpop.f32.mrb[2].mxu1  ;;  %1321 = vmatpush3.bf16.msra.mxu0 %v1320_v15  ;;  %v1367_v7 = vpack.c.bf16 %v733_v4, %v725_v3  ;;  %v492_v15 = vpop.f32.mrb[3].mxu0 }
 0x115   : > { %v603_v22 = vpop.f32.mrb[3].mxu1  ;;  %1322 = vmatprep.subr.bf16.mxu0 %v1460_v41  ;;  %v721_v41 = vld [vmem:[#allocation2 + $0x100] sm:$0xff] }
 0x116   : > { %1380 = vmatpush1.bf16.msra.mxu1 %v1379_v9  ;;  %v1323_v28 = vpack.c.bf16 %v1283_v19, %v603_v22  ;;  %v1335_v45 = vpack.c.bf16 %v729_v42, %v721_v41  ;;  %v741_v9 = vld [vmem:[#allocation2 + $0x1a0] sm:$0xff] }
 0x117   : > { %1382 = vmatprep.subr.bf16.mxu1 %v1381_v12  ;;  %v1371_v11 = vpack.c.bf16 %v749_v10, %v741_v9 }
 0x118   : > { %1324 = vmatpush3.bf16.msra.mxu0 %v1323_v28 }
 0x119   : > { %1326 = vmatprep.subr.bf16.mxu0 %v1325_v23 }
 0x11a   : > { %1384 = vmatpush1.bf16.msra.mxu1 %v1383_v21 }
 0x11b   : > { %1386 = vmatprep.subr.bf16.mxu1 %v1385_v25  ;;  %1293 = vmatmul.mubr.msk.f32.vlgmr.msra.gmra.mrb[4].mxu0 %vm403_vm1, %v612_v31 }
 0x11c   : > { %1328 = vmatpush1.bf16.msra.mxu0 %v1327_v32  ;;  %820 = vmatprep.mubr.f32.mxu0 %v1462_v53 }
 0x11d   : > { %1330 = vmatprep.subr.bf16.mxu0 %v1329_v34 }
 0x11e   : > { %1388 = vmatpush1.bf16.msra.mxu1 %v1387_v33 }
 0x120   : > { %1332 = vmatpush1.bf16.msra.mxu0 %v1331_v39 }
 0x121   : > { %1217 = vmatmul.mubr.msk.f32.vlgmr.msra.gmra.mrb[6].mxu1 %vm501_vm0, %v1634_v2  ;;  %1334 = vmatprep.subr.bf16.mxu0 %v1333_v40 }
 0x124   : > { %1336 = vmatpush1.bf16.msra.mxu0 %v1335_v45 }
 0x125   : > { %1338 = vmatprep.subr.bf16.mxu0 %v1337_v46 }
 0x128   : > { %1340 = vmatpush1.bf16.msra.mxu0 %v1339_v51 }
 0x129   : > { %1358 = vmatprep.subr.bf16.mxu0 %v1357_v52 }
 0x12b   : > { %1214 = vmatmul.mubr.msk.f32.vlgmr.msra.gmra.mrb[6].mxu0 %vm501_vm0, %v1634_v2 }
 0x12c   : > { %1360 = vmatpush1.bf16.msra.mxu0 %v1359_v58  ;;  %962 = vmatprep.mubr.f32.mxu0 %v1462_v53  ;;  %v396_v53 = vpop.permute.xlu1 %395 }
 0x12d   : > { %1362 = vmatprep.subr.bf16.mxu0 %v1361_v59  ;;  %v493_v16 = vadd.f32 %v492_v15, %v396_v53 }
 0x12f   : > { %504 = vst.msk [vmem:[%s1632_s29 + $0x10] sm:$0xff] %vm501_vm0, %v493_v16 }
 0x130   : > { %1364 = vmatpush1.bf16.msra.mxu0 %v1363_v0  ;;  %v401_v12 = vpop.permute.xlu1 %400 }
 0x131   : > { %1366 = vmatprep.subr.bf16.mxu0 %v1365_v1  ;;  %v498_v14 = vadd.f32 %v1261_v13, %v401_v12 }
 0x133   : > { %506 = vst.msk [vmem:[%s1632_s29 + $0x18] sm:$0x3f] %vm505_vm3, %v498_v14 }
 0x134   : > { %1368 = vmatpush1.bf16.msra.mxu0 %v1367_v7 }
 0x135   : > { %1370 = vmatprep.subr.bf16.mxu0 %v1369_v8 }
 0x138   : > { %1372 = vmatpush1.bf16.msra.mxu0 %v1371_v11 }
 0x13b   : > { %1216 = vmatmul.mubr.msk.f32.vlgmr.msra.gmra.mrb[8].mxu0 %vm501_vm0, %v1634_v2  ;;  %v613_v2 = vld [vmem:[%s1678_s4] sm:$0x1f] }
 0x1e4   : > { %v893_v17 = vpop.f32.mrb[4].mxu1 }
 0x1e5   : > { %v895_v18 = vpop.f32.mrb[5].mxu1 }
 0x1e6   : > { %v1049_v19 = vcombine.low %v893_v17, %v895_v18 }
 0x1e8   : > { %1057 = vst [vmem:[%s370_s15 + $0x8] sm:$0x77] %v1049_v19 }
 0x1ee   : > { %v683_v20 = vpop.f32.mrb[4].mxu0 }
 0x1ef   : > { %v684_v21 = vadd.f32 %v683_v20, %v613_v2  ;;  %v1294_v22 = vpop.f32.mrb[5].mxu0 }
 0x1f1   : > { %688 = vst.msk [vmem:[%s365_s21] sm:$0x1f] %vm687_vm4, %v684_v21 }
 0x1f4   : > { %v1035_v23 = vpop.f32.mrb[6].mxu1 }
 0x1f5   : > { %v1037_v24 = vpop.f32.mrb[7].mxu1 }
 0x1f6   : > { %v1051_v25 = vcombine.low %v1035_v23, %v1037_v24 }
 0x1f8   : > { %1059 = vst [vmem:[%s370_s15 + $0x18] sm:$0x77] %v1051_v25 }
 0x1fe   : > { %v822_v26 = vpop.f32.mrb[6].mxu0 }
 0x1ff   : > { %v824_v27 = vpop.f32.mrb[7].mxu0 }
 0x200   : > { %v1048_v28 = vcombine.low %v822_v26, %v824_v27 }
 0x202   : > { %1056 = vst [vmem:[%s370_s15] sm:$0x77] %v1048_v28 }
 0x20e   : > { %v964_v29 = vpop.f32.mrb[8].mxu0 }
 0x20f   : > { %v966_v30 = vpop.f32.mrb[9].mxu0 }
 0x210   : > { %v1050_v31 = vcombine.low %v964_v29, %v966_v30 }
 0x212   : > { %1058 = vst [vmem:[%s370_s15 + $0x10] sm:$0x77] %v1050_v31 }
 0x213 PF: > { %s21_s30 = sadd.s32 1, %s1454_s30  }
 0x214   : > { %p18_p3 = scmp.ge.s32.totalorder %s21_s30, 4  }
 0x216   :  { %20 = sbr.rel (!%p18_p3) target bundleno = 1 (0x1), region = 107 }
 0x21d   :  { %1111 = vsyncpa [#allocation3], 1 }
 0x21e   :  { %1113 = vsyncpa [#allocation3 + $0x1], 1 }

</bundles_post_ra>
